<compile_context>
chip_gen: v7x
topology: tpu7x:2x2x1
jax: 0.10.0
libtpu: 0.0.40
codegen_flags: <defaults>
</compile_context>

<pallas_src>
import functools
import math

import jax
import jax.numpy as jnp
from jax.experimental import pallas as pl
from jax.experimental.pallas import tpu as pltpu

_LOG_2PI = math.log(2.0 * math.pi)


# ---------------------------------------------------------------------------
# Kernel
# ---------------------------------------------------------------------------
def _ac_kernel(obs_ref, eps_ref, wb_ref, wh_ref, out_ref, *, A, Hp):
    """Fused actor-critic forward; writes a packed [bb, 128] output slab."""
    obs = obs_ref[...]                                              # [bb, S]
    eps = eps_ref[...]                                              # [bb, A]
    S = obs.shape[1]
    bb = obs.shape[0]
    two_hp = 2 * Hp

    # Fused actor_body + critic_body:  tanh(Linear(S, 88)) padded to Hp lanes each.
    #   w_body rows 0..S-1 = [wa | wc], row S = [ba | bc]
    body = jnp.dot(obs, wb_ref[:S, :], preferred_element_type=jnp.float32)
    body = jnp.tanh(body + wb_ref[S:S + 1, :])                      # [bb, 2*Hp]

    # Fused fc_action + fc_critic via one block-structured weight:
    #   head[:, :A] = fc_action(phi_a),  head[:, A] = fc_critic(phi_v)
    head = jnp.dot(body, wh_ref[:two_hp, :], preferred_element_type=jnp.float32)
    head = head + wh_ref[two_hp:two_hp + 1, :]                      # [bb, 128]

    mean = jnp.tanh(head[:, :A])                                    # [bb, A]
    v = head[:, A:A + 1]                                            # [bb, 1]

    # Normal(mean, softplus(std)); std parameter packed as the last row of w_head.
    std_p = wh_ref[two_hp + 1:two_hp + 2, :A]                       # [1, A]
    std = jnp.maximum(std_p, 0.0) + jnp.log1p(jnp.exp(-jnp.abs(std_p)))  # stable softplus
    log_std = jnp.log(std)                                          # [1, A]

    # dist.sample(): action = mean + std * eps ; reference returns tanh(action) as 'a'.
    action = mean + std * eps
    dis_action = jnp.tanh(action)

    # dist.log_prob(action).sum(-1): (action - mean)/std == eps exactly by construction.
    logp = jnp.sum(-0.5 * (eps * eps) - log_std - 0.5 * _LOG_2PI,
                   axis=-1, keepdims=True)                          # [bb, 1]

    # dist.entropy().sum(-1): batch-independent -> compute once, broadcast.
    ent11 = jnp.sum(0.5 + 0.5 * _LOG_2PI + log_std, axis=-1, keepdims=True)  # [1, 1]
    ent = jnp.broadcast_to(ent11, (bb, 1))

    # Single lane-dense output slab: [a | mean | logp | ent | v | zero pad]
    out_ref[...] = jnp.zeros_like(out_ref)
    out_ref[:, 0:A] = dis_action
    out_ref[:, A:2 * A] = mean
    out_ref[:, 2 * A:2 * A + 1] = logp
    out_ref[:, 2 * A + 1:2 * A + 2] = ent
    out_ref[:, 2 * A + 2:2 * A + 3] = v


# ---------------------------------------------------------------------------
# Parameter packing (done once per parameter update, plain JAX)
# ---------------------------------------------------------------------------
def pack_params(params, *, hidden_pad=128):
    """Pack the 9 per-layer tensors into two lane-dense slabs."""
    wa, ba = params["actor_body_w"], params["actor_body_b"]
    wc, bc = params["critic_body_w"], params["critic_body_b"]
    wfa, bfa = params["fc_action_w"], params["fc_action_b"]
    wfv, bfv = params["fc_critic_w"], params["fc_critic_b"]
    std = params["std"]

    S, H = wa.shape
    A = wfa.shape[1]
    Hp = hidden_pad
    assert H <= Hp and 2 * A + 3 <= 128

    # [S+1, 2*Hp]: rows 0..S-1 = [wa | wc] (zero-padded to Hp lanes each), row S = biases.
    w_body = jnp.zeros((S + 1, 2 * Hp), jnp.float32)
    w_body = w_body.at[:S, :H].set(wa)
    w_body = w_body.at[:S, Hp:Hp + H].set(wc)
    w_body = w_body.at[S, :H].set(ba[0])
    w_body = w_body.at[S, Hp:Hp + H].set(bc[0])

    # [2*Hp+2, 128]: block-structured heads, then bias row, then std-parameter row.
    w_head = jnp.zeros((2 * Hp + 2, 128), jnp.float32)
    w_head = w_head.at[:H, :A].set(wfa)                # phi_a rows -> action columns
    w_head = w_head.at[Hp:Hp + H, A:A + 1].set(wfv)    # phi_v rows -> value column
    w_head = w_head.at[2 * Hp, :A].set(bfa[0])
    w_head = w_head.at[2 * Hp, A:A + 1].set(bfv[0])
    w_head = w_head.at[2 * Hp + 1, :A].set(std[0])

    return {"w_body": w_body, "w_head": w_head, "action_dim": A, "hidden_pad": Hp}


# ---------------------------------------------------------------------------
# Forward wrapper
# ---------------------------------------------------------------------------
def gaussian_actor_critic_forward(obs, packed, key, *, block_b=None):
    """Forward pass. `packed` comes from pack_params; `key` drives dist.sample()."""
    # TODO(synk): the optional `action=` argument of the reference forward (log_prob of
    # a caller-supplied action) is not implemented; only the action=None sampling path.
    B, S = obs.shape
    A = packed["action_dim"]
    Hp = packed["hidden_pad"]
    wb, wh = packed["w_body"], packed["w_head"]

    # Row tile over the batch: single block at small B; 512-row tiles when batched
    # large (keeps per-step overhead small, well under VMEM on v5e/v6e/v7x).
    if block_b is None:
        block_b = B if B <= 512 else 512
    assert B % block_b == 0, "batch must be a multiple of the row tile"
    grid = (B // block_b,)

    # Host-side standard normal noise; consumed as eps inside the kernel so that
    # (action - mean)/std == eps exactly (no divide in-kernel).
    eps = jax.random.normal(key, (B, A), jnp.float32)

    kernel = functools.partial(_ac_kernel, A=A, Hp=Hp)
    grid_spec = pltpu.PrefetchScalarGridSpec(
        num_scalar_prefetch=0,
        grid=grid,
        in_specs=[
            pl.BlockSpec((block_b, S), lambda i: (i, 0)),
            pl.BlockSpec((block_b, A), lambda i: (i, 0)),
            pl.BlockSpec((S + 1, 2 * Hp), lambda i: (0, 0)),
            pl.BlockSpec((2 * Hp + 2, 128), lambda i: (0, 0)),
        ],
        out_specs=pl.BlockSpec((block_b, 128), lambda i: (i, 0)),
    )
    slab = pl.pallas_call(
        kernel,
        out_shape=jax.ShapeDtypeStruct((B, 128), jnp.float32),
        grid_spec=grid_spec,
        compiler_params=pltpu.CompilerParams(dimension_semantics=("parallel",)),
    )(obs, eps, wb, wh)

    return {
        "a": slab[:, 0:A],
        "log_pi_a": slab[:, 2 * A:2 * A + 1],
        "ent": slab[:, 2 * A + 1:2 * A + 2],
        "mean": slab[:, A:2 * A],
        "v": slab[:, 2 * A + 2:2 * A + 3],
    }


# ---------------------------------------------------------------------------
# Parameter init (torch-equivalent shapes; hidden=88 hardcoded like the module)
# ---------------------------------------------------------------------------
def init_params(key, state_dim, action_dim, hidden=88):
    ks = jax.random.split(key, 4)
    return {
        "actor_body_w": jax.random.normal(ks[0], (state_dim, hidden), jnp.float32)
                        / jnp.sqrt(state_dim),
        "actor_body_b": jnp.zeros((1, hidden), jnp.float32),
        "critic_body_w": jax.random.normal(ks[1], (state_dim, hidden), jnp.float32)
                         / jnp.sqrt(state_dim),
        "critic_body_b": jnp.zeros((1, hidden), jnp.float32),
        "fc_action_w": 0.001 * jax.random.normal(ks[2], (hidden, action_dim), jnp.float32),
        "fc_action_b": jnp.zeros((1, action_dim), jnp.float32),
        "fc_critic_w": 0.001 * jax.random.normal(ks[3], (hidden, 1), jnp.float32),
        "fc_critic_b": jnp.zeros((1, 1), jnp.float32),
        "std": jnp.zeros((1, action_dim), jnp.float32),   # nn.Parameter(zeros(action_dim))
    }


def _reference(obs, params, eps):
    """Pure-JAX reference of the full forward (same eps as the kernel)."""
    phi_a = jnp.tanh(obs @ params["actor_body_w"] + params["actor_body_b"])
    phi_v = jnp.tanh(obs @ params["critic_body_w"] + params["critic_body_b"])
    mean = jnp.tanh(phi_a @ params["fc_action_w"] + params["fc_action_b"])
    v = phi_v @ params["fc_critic_w"] + params["fc_critic_b"]
    std = jax.nn.softplus(params["std"])
    log_std = jnp.log(std)
    action = mean + std * eps
    a = jnp.tanh(action)
    z = (action - mean) / std
    logp = jnp.sum(-0.5 * z * z - log_std - 0.5 * _LOG_2PI, axis=-1, keepdims=True)
    ent = jnp.sum(0.5 + 0.5 * _LOG_2PI + log_std, axis=-1, keepdims=True)
    ent = jnp.broadcast_to(ent, (obs.shape[0], 1))
    return {"a": a, "log_pi_a": logp, "ent": ent, "mean": mean, "v": v}


if __name__ == "__main__":
    B, STATE_DIM, ACTION_DIM = 8, 32, 4

    key = jax.random.PRNGKey(0)
    k_obs, k_param, k_sample = jax.random.split(key, 3)

    obs = jax.random.normal(k_obs, (B, STATE_DIM), jnp.float32)
    params = init_params(k_param, STATE_DIM, ACTION_DIM)
    packed = pack_params(params)

    out = gaussian_actor_critic_forward(obs, packed, k_sample)
    jax.block_until_ready(out)

    # Shape checks (matches the PyTorch forward's return dict).
    assert out["a"].shape == (B, ACTION_DIM)
    assert out["mean"].shape == (B, ACTION_DIM)
    assert out["log_pi_a"].shape == (B, 1)
    assert out["ent"].shape == (B, 1)
    assert out["v"].shape == (B, 1)

    # Numeric check against a pure-JAX reference using the same eps.
    eps = jax.random.normal(k_sample, (B, ACTION_DIM), jnp.float32)
    ref = _reference(obs, params, eps)
    assert bool(jnp.allclose(out["mean"], ref["mean"], rtol=5e-2, atol=1e-3))
    assert bool(jnp.allclose(out["v"], ref["v"], rtol=5e-2, atol=1e-3))
    assert bool(jnp.allclose(out["ent"], ref["ent"], rtol=1e-3, atol=1e-4))
    assert bool(jnp.allclose(out["a"], ref["a"], rtol=5e-2, atol=1e-3))
    assert bool(jnp.allclose(out["log_pi_a"], ref["log_pi_a"], rtol=5e-2, atol=1e-3))
    # Sampled action is tanh-squashed, hence finite and in [-1, 1].
    assert bool(jnp.all(jnp.isfinite(out["a"])))
    assert bool(jnp.all(jnp.abs(out["a"]) <= 1.0))

    print("KERNEL_OK")
</pallas_src>

<mosaic_0001>
module attributes {stable_mosaic.version = 11 : i64} {
  func.func @_ac_kernel(%arg0: i32, %arg1: memref<8x32xf32, #tpu.memory_space<vmem>>, %arg2: memref<8x4xf32, #tpu.memory_space<vmem>>, %arg3: memref<33x256xf32, #tpu.memory_space<vmem>>, %arg4: memref<258x128xf32, #tpu.memory_space<vmem>>, %arg5: memref<8x128xf32, #tpu.memory_space<vmem>>) attributes {dimension_semantics = [#tpu.dimension_semantics<parallel>], iteration_bounds = array<i64: 1>, scalar_prefetch = 0 : i64, scratch_operands = 0 : i64, tpu.core_type = #tpu.core_type<tc>, window_params = [{transform_indices = @transform_0, window_bounds = array<i64: 8, 32>}, {transform_indices = @transform_1, window_bounds = array<i64: 8, 4>}, {pipeline_mode = #tpu.pipeline_mode<synchronous>, transform_indices = @transform_2, window_bounds = array<i64: 33, 256>}, {pipeline_mode = #tpu.pipeline_mode<synchronous>, transform_indices = @transform_3, window_bounds = array<i64: 258, 128>}, {transform_indices = @transform_4, window_bounds = array<i64: 8, 128>}]} {
    %c0 = arith.constant 0 : index
    %c0_0 = arith.constant 0 : index
    %0 = vector.load %arg1[%c0, %c0_0] : memref<8x32xf32, #tpu.memory_space<vmem>>, vector<8x32xf32>
    %c0_1 = arith.constant 0 : index
    %c0_2 = arith.constant 0 : index
    %1 = vector.load %arg2[%c0_1, %c0_2] : memref<8x4xf32, #tpu.memory_space<vmem>>, vector<8x4xf32>
    %c0_3 = arith.constant 0 : index
    %c0_4 = arith.constant 0 : index
    %2 = vector.load %arg3[%c0_3, %c0_4] : memref<33x256xf32, #tpu.memory_space<vmem>>, vector<32x256xf32>
    %cst = arith.constant dense<0.000000e+00> : vector<8x256xf32>
    %3 = tpu.matmul %0, %2, %cst {dimension_numbers = #tpu.dot_dimension_numbers<[1], [0], [0], [1], [0, 0, 1, 1], [], []>} : vector<8x32xf32>, vector<32x256xf32>, vector<8x256xf32> -> vector<8x256xf32>
    %c32 = arith.constant 32 : index
    %c0_5 = arith.constant 0 : index
    %4 = vector.load %arg3[%c32, %c0_5] : memref<33x256xf32, #tpu.memory_space<vmem>>, vector<1x256xf32>
    %5 = vector.broadcast %4 : vector<1x256xf32> to vector<8x256xf32>
    %6 = arith.addf %3, %5 : vector<8x256xf32>
    %7 = math.tanh %6 : vector<8x256xf32>
    %c0_6 = arith.constant 0 : index
    %c0_7 = arith.constant 0 : index
    %8 = vector.load %arg4[%c0_6, %c0_7] : memref<258x128xf32, #tpu.memory_space<vmem>>, vector<256x128xf32>
    %cst_8 = arith.constant dense<0.000000e+00> : vector<8x128xf32>
    %9 = tpu.matmul %7, %8, %cst_8 {dimension_numbers = #tpu.dot_dimension_numbers<[1], [0], [0], [1], [0, 0, 1, 1], [], []>} : vector<8x256xf32>, vector<256x128xf32>, vector<8x128xf32> -> vector<8x128xf32>
    %c256 = arith.constant 256 : index
    %c0_9 = arith.constant 0 : index
    %10 = vector.load %arg4[%c256, %c0_9] : memref<258x128xf32, #tpu.memory_space<vmem>>, vector<1x128xf32>
    %11 = vector.broadcast %10 : vector<1x128xf32> to vector<8x128xf32>
    %12 = arith.addf %9, %11 : vector<8x128xf32>
    %13 = vector.extract_strided_slice %12 {offsets = [0, 0], sizes = [8, 4], strides = [1, 1]} : vector<8x128xf32> to vector<8x4xf32>
    %14 = math.tanh %13 : vector<8x4xf32>
    %15 = vector.extract_strided_slice %12 {offsets = [0, 4], sizes = [8, 1], strides = [1, 1]} : vector<8x128xf32> to vector<8x1xf32>
    %c257 = arith.constant 257 : index
    %c0_10 = arith.constant 0 : index
    %16 = vector.load %arg4[%c257, %c0_10] : memref<258x128xf32, #tpu.memory_space<vmem>>, vector<1x4xf32>
    %cst_11 = arith.constant 0.000000e+00 : f32
    %17 = vector.broadcast %cst_11 : f32 to vector<1x4xf32>
    %18 = arith.maximumf %16, %17 : vector<1x4xf32>
    %19 = math.absf %16 : vector<1x4xf32>
    %cst_12 = arith.constant 0.000000e+00 : f32
    %20 = vector.broadcast %cst_12 : f32 to vector<1x4xf32>
    %21 = arith.subf %20, %19 : vector<1x4xf32>
    %22 = math.exp %21 : vector<1x4xf32>
    %23 = math.log1p %22 : vector<1x4xf32>
    %24 = arith.addf %18, %23 : vector<1x4xf32>
    %25 = math.log %24 : vector<1x4xf32>
    %26 = vector.broadcast %24 : vector<1x4xf32> to vector<8x4xf32>
    %27 = arith.mulf %26, %1 : vector<8x4xf32>
    %28 = arith.addf %14, %27 : vector<8x4xf32>
    %29 = math.tanh %28 : vector<8x4xf32>
    %30 = arith.mulf %1, %1 : vector<8x4xf32>
    %cst_13 = arith.constant -5.000000e-01 : f32
    %31 = vector.broadcast %cst_13 : f32 to vector<8x4xf32>
    %32 = arith.mulf %31, %30 : vector<8x4xf32>
    %33 = vector.broadcast %25 : vector<1x4xf32> to vector<8x4xf32>
    %34 = arith.subf %32, %33 : vector<8x4xf32>
    %cst_14 = arith.constant 0.918938517 : f32
    %35 = vector.broadcast %cst_14 : f32 to vector<8x4xf32>
    %36 = arith.subf %34, %35 : vector<8x4xf32>
    %cst_15 = arith.constant dense<0.000000e+00> : vector<8xf32>
    %37 = vector.multi_reduction <add>, %36, %cst_15 [1] : vector<8x4xf32> to vector<8xf32>
    %38 = vector.shape_cast %37 : vector<8xf32> to vector<8x1xf32>
    %cst_16 = arith.constant 1.41893852 : f32
    %39 = vector.broadcast %cst_16 : f32 to vector<1x4xf32>
    %40 = arith.addf %39, %25 : vector<1x4xf32>
    %cst_17 = arith.constant dense<0.000000e+00> : vector<1xf32>
    %41 = vector.multi_reduction <add>, %40, %cst_17 [1] : vector<1x4xf32> to vector<1xf32>
    %42 = vector.shape_cast %41 : vector<1xf32> to vector<1x1xf32>
    %43 = vector.shape_cast %42 : vector<1x1xf32> to vector<1x1xf32>
    %44 = vector.broadcast %43 : vector<1x1xf32> to vector<8x1xf32>
    %cst_18 = arith.constant 0.000000e+00 : f32
    %45 = vector.broadcast %cst_18 : f32 to vector<8x128xf32>
    %c0_19 = arith.constant 0 : index
    %c0_20 = arith.constant 0 : index
    %46 = vector.load %arg5[%c0_19, %c0_20] : memref<8x128xf32, #tpu.memory_space<vmem>>, vector<8x128xf32>
    tpu.vector_store %arg5[%c0_19, %c0_20], %45 {strides = array<i32>} : memref<8x128xf32, #tpu.memory_space<vmem>>, vector<8x128xf32>,
    %c0_21 = arith.constant 0 : index
    %c0_22 = arith.constant 0 : index
    %47 = vector.load %arg5[%c0_21, %c0_22] : memref<8x128xf32, #tpu.memory_space<vmem>>, vector<8x4xf32>
    tpu.vector_store %arg5[%c0_21, %c0_22], %29 {strides = array<i32>} : memref<8x128xf32, #tpu.memory_space<vmem>>, vector<8x4xf32>,
    %c0_23 = arith.constant 0 : index
    %c4 = arith.constant 4 : index
    %48 = vector.load %arg5[%c0_23, %c4] : memref<8x128xf32, #tpu.memory_space<vmem>>, vector<8x4xf32>
    tpu.vector_store %arg5[%c0_23, %c4], %14 {strides = array<i32>} : memref<8x128xf32, #tpu.memory_space<vmem>>, vector<8x4xf32>,
    %c0_24 = arith.constant 0 : index
    %c8 = arith.constant 8 : index
    %49 = vector.load %arg5[%c0_24, %c8] : memref<8x128xf32, #tpu.memory_space<vmem>>, vector<8x1xf32>
    tpu.vector_store %arg5[%c0_24, %c8], %38 {strides = array<i32>} : memref<8x128xf32, #tpu.memory_space<vmem>>, vector<8x1xf32>,
    %c0_25 = arith.constant 0 : index
    %c9 = arith.constant 9 : index
    %50 = vector.load %arg5[%c0_25, %c9] : memref<8x128xf32, #tpu.memory_space<vmem>>, vector<8x1xf32>
    tpu.vector_store %arg5[%c0_25, %c9], %44 {strides = array<i32>} : memref<8x128xf32, #tpu.memory_space<vmem>>, vector<8x1xf32>,
    %c0_26 = arith.constant 0 : index
    %c10 = arith.constant 10 : index
    %51 = vector.load %arg5[%c0_26, %c10] : memref<8x128xf32, #tpu.memory_space<vmem>>, vector<8x1xf32>
    tpu.vector_store %arg5[%c0_26, %c10], %15 {strides = array<i32>} : memref<8x128xf32, #tpu.memory_space<vmem>>, vector<8x1xf32>,
    return
  }
  func.func @transform_0(%arg0: i32) -> (i32, i32) {
    %c0_i32 = arith.constant 0 : i32
    %c0_i32_0 = arith.constant 0 : i32
    return %arg0, %c0_i32 : i32, i32
  }
  func.func @transform_1(%arg0: i32) -> (i32, i32) {
    %c0_i32 = arith.constant 0 : i32
    %c0_i32_0 = arith.constant 0 : i32
    return %arg0, %c0_i32 : i32, i32
  }
  func.func @transform_2(%arg0: i32) -> (i32, i32) {
    %c0_i32 = arith.constant 0 : i32
    %c0_i32_0 = arith.constant 0 : i32
    %c0_i32_1 = arith.constant 0 : i32
    return %c0_i32, %c0_i32_0 : i32, i32
  }
  func.func @transform_3(%arg0: i32) -> (i32, i32) {
    %c0_i32 = arith.constant 0 : i32
    %c0_i32_0 = arith.constant 0 : i32
    %c0_i32_1 = arith.constant 0 : i32
    return %c0_i32, %c0_i32_0 : i32, i32
  }
  func.func @transform_4(%arg0: i32) -> (i32, i32) {
    %c0_i32 = arith.constant 0 : i32
    %c0_i32_0 = arith.constant 0 : i32
    return %arg0, %c0_i32 : i32, i32
  }
}

</mosaic_0001>

<bundles_post_ra>
// kernel: tpu_custom_call.1
= control target key start
LH: loop header
LB: loop body
LE: loop exit
PB: predicated region body
PF: predicated region fallthrough
CT: control target
= control target key end

     0   :  { %9 = vsyncpa [#allocation3], 0  ;;  %s587_s0 = inlined_call_operand.vmem [shape: f32[8,32], index: 0, kind: input, shape index: {}]   ;;  %s588_s1 = inlined_call_operand.vmem [shape: f32[8,4], index: 1, kind: input, shape index: {}]   ;;  %s589_s2 = inlined_call_operand.hbm [shape: f32[33,256], index: 2, kind: input, shape index: {}]   ;;  %s590_s3 = inlined_call_operand.hbm [shape: f32[258,128], index: 3, kind: input, shape index: {}]   ;;  %s591_s4 = inlined_call_operand.hbm [shape: f32[8,128], index: 4, kind: output, shape index: {}]  }
   0x1   :  { %10 = vsyncpa [#allocation6], 0 }
   0x2   :  { %11 = vsyncpa [#allocation4], 0  ;;  %s508_s15 = smov [#allocation2]   ;;  %s436_s19 = scalar_lea.hbm %s589_s2, 1280 }
   0x3   :  { %s21_s16 = sshll.u32 %s508_s15, 4  ;;  %p437_p0 = scmp.ne.s32.totalorder %s589_s2, %s436_s19  ;;  %s22_s16 = int_to_ptr.vmem [resolvable:$true] %s21_s16 }
   0x4   :  { %p440_p1 = scmp.lt.u32.totalorder %s436_s19, %s589_s2 }
   0x6   :  { %p442_p2 = pnand %p440_p1, %p437_p0 }
   0x8   :  { %445 = shalt.err (!%p442_p2)
}
   0x9   :  { %s446_s24 = scalar_lea.vmem %s22_s16, 1280  ;;  %p451_p4 = scmp.lt.s32.totalorder %s22_s16, %s22_s16 }
   0xa   :  { %p447_p3 = scmp.ne.s32.totalorder %s22_s16, %s446_s24  ;;  %p452_p5 = scmp.lt.s32.totalorder %s446_s24, %s446_s24 }
   0xc   :  { %p453_p6 = por %p452_p5, %p451_p4 }
   0xe   :  { %p454_p7 = pnand %p453_p6, %p447_p3 }
  0x10   :  { %457 = shalt.err (!%p454_p7)
}
  0x11   :  { %s509_s25 = smov 256   ;;  %s510_s26 = smov 16  }
  0x12   :  { %27 = dma.hbm_to_vmem [thread:$0]  %s589_s2, 1280, %s22_s16, [#allocation3], %s509_s25, %s509_s25, %s510_s26  }
  0x13   :  { %s511_s29 = smov [#allocation5]   ;;  %s458_s7 = scalar_lea.hbm %s590_s3, 4224 }
  0x14   :  { %s33_s30 = sshll.u32 %s511_s29, 4  ;;  %p459_p8 = scmp.ne.s32.totalorder %s590_s3, %s458_s7  ;;  %s34_s30 = int_to_ptr.vmem [resolvable:$true] %s33_s30 }
  0x15   :  { %p462_p9 = scmp.lt.u32.totalorder %s458_s7, %s590_s3 }
  0x17   :  { %p464_p10 = pnand %p462_p9, %p459_p8 }
  0x19   :  { %467 = shalt.err (!%p464_p10)
}
  0x1a   :  { %s468_s12 = scalar_lea.vmem %s34_s30, 4224  ;;  %p473_p12 = scmp.lt.s32.totalorder %s34_s30, %s34_s30 }
  0x1b   :  { %p469_p11 = scmp.ne.s32.totalorder %s34_s30, %s468_s12  ;;  %p474_p13 = scmp.lt.s32.totalorder %s468_s12, %s468_s12 }
  0x1d   :  { %p475_p0 = por %p474_p13, %p473_p12 }
  0x1f   :  { %p476_p1 = pnand %p475_p0, %p469_p11 }
  0x21   :  { %479 = shalt.err (!%p476_p1)
}
  0x22   :  { %s512_s2 = smov 128   ;;  %s513_s13 = smov 8  }
  0x23   :  { %39 = dma.hbm_to_vmem [thread:$0]  %s590_s3, 4224, %s34_s30, [#allocation6], %s512_s2, %s512_s2, %s513_s13  }
  0x24   :  { %502 = dma.done.wait [#allocation3], 1280  }
  0x25   :  { %503 = vsyncadd [#allocation3], 4294966016 }
  0x26   :  { %504 = dma.done.wait [#allocation6], 4224  }
  0x27   :  { %505 = vsyncadd [#allocation6], 4294963072  ;;  %v514_v0 = vmov 0.0   ;;  %v49_v1 = vld [vmem:[#allocation2 + $0x8] sm:$0xff]  ;;  %v51_v2 = vld [vmem:[#allocation2 + $0x18] sm:$0xff]  ;;  %vm69_vm0 = vcmask 261120  }
  0x28   :  { %137 = vmatprep.mubr.f32.mxu0 %v514_v0  ;;  %300 = vst [vmem:[#allocation7] sm:$0xff] %v514_v0  ;;  %v48_v3 = vld [vmem:[#allocation2] sm:$0xff]  ;;  %v372_v4 = vpack.c.bf16 %v51_v2, %v49_v1  ;;  %v50_v5 = vld [vmem:[#allocation2 + $0x10] sm:$0xff]  ;;  %v53_v6 = vld [vmem:[#allocation2 + $0x28] sm:$0xff]  ;;  %vm292_vm2 = vcmask 24576   ;;  %vm287_vm3 = vcmask 31744  }
  0x29   :  { %v55_v7 = vld [vmem:[#allocation2 + $0x38] sm:$0xff]  ;;  %v374_v8 = vpack.c.bf16 %v50_v5, %v48_v3  ;;  %v52_v10 = vld [vmem:[#allocation2 + $0x20] sm:$0xff]  ;;  %v54_v11 = vld [vmem:[#allocation2 + $0x30] sm:$0xff]  ;;  %s516_s18 = smov 6   ;;  %vm306_vm4 = vcmask 64544   ;;  %vm308_vm5 = vcmask 72768  }
  0x2a   :  { %v376_v9 = vpack.c.bf16 %v55_v7, %v53_v6  ;;  %373 = vmatprep.subr.bf16.mxu0 %v372_v4  ;;  %v162_v12 = vld [vmem:[#allocation5 + $0x80] sm:$0xff]  ;;  %v163_v13 = vld [vmem:[#allocation5 + $0x88] sm:$0xff]  ;;  %v378_v15 = vpack.c.bf16 %v54_v11, %v52_v10  ;;  %v164_v18 = vld [vmem:[#allocation5 + $0x90] sm:$0xff]  ;;  %v59_v6 = vlaneseq  ;;  %vm310_vm6 = vcmask 80968   ;;  %s517_s19 = smov [#allocation7]  }
  0x2b   :  { %v146_v14 = vld [vmem:[#allocation5] sm:$0xff]  ;;  %375 = vmatpush1.bf16.msra.mxu0 %v374_v8  ;;  %v380_v16 = vpack.c.bf16 %v163_v13, %v162_v12  ;;  %v147_v17 = vld [vmem:[#allocation5 + $0x8] sm:$0xff]  ;;  %v165_v19 = vld [vmem:[#allocation5 + $0x98] sm:$0xff]  ;;  %s324_s20 = sshll.u32 %s517_s19, 4  ;;  %vm316_vm7 = vcmask 89168   ;;  %s325_s20 = int_to_ptr.vmem [resolvable:$true] %s324_s20 }
  0x2c   :  { %377 = vmatprep.subr.bf16.mxu0 %v376_v9  ;;  %v382_v20 = vpack.c.bf16 %v147_v17, %v146_v14  ;;  %v384_v21 = vpack.c.bf16 %v165_v19, %v164_v18  ;;  %v148_v22 = vld [vmem:[#allocation5 + $0x10] sm:$0xff]  ;;  %v149_v23 = vld [vmem:[#allocation5 + $0x18] sm:$0xff]  ;;  %v166_v24 = vld [vmem:[#allocation5 + $0xa0] sm:$0xff]  ;;  %v60_v10 = vshrl.u32 %v59_v6, 7  ;;  %s480_s21 = scalar_lea.vmem %s325_s20, 128  ;;  %p485_p3 = scmp.lt.s32.totalorder %s325_s20, %s325_s20 }
  0x2d   :  { %381 = vmatprep.subr.bf16.mxu1 %v380_v16  ;;  %v167_v25 = vld [vmem:[#allocation5 + $0xa8] sm:$0xff]  ;;  %v386_v26 = vpack.c.bf16 %v149_v23, %v148_v22  ;;  %v46_v27 = vld [vmem:[%s587_s0] sm:$0xff]  ;;  %v150_v29 = vld [vmem:[#allocation5 + $0x20] sm:$0xff]  ;;  %p481_p2 = scmp.ne.s32.totalorder %s325_s20, %s480_s21  ;;  %p486_p4 = scmp.lt.s32.totalorder %s480_s21, %s480_s21 }
  0x2e   :  { %383 = vmatpush3.bf16.msra.mxu1 %v382_v20  ;;  %v388_v28 = vpack.c.bf16 %v167_v25, %v166_v24  ;;  %v151_v30 = vld [vmem:[#allocation5 + $0x28] sm:$0xff]  ;;  %v168_v31 = vld [vmem:[#allocation5 + $0xb0] sm:$0xff]  ;;  %v169_v32 = vld [vmem:[#allocation5 + $0xb8] sm:$0xff]  ;;  %v61_v14 = vsub.s32 0, %v60_v10 }
  0x2f   :  { %379 = vmatpush1.bf16.msra.mxu0 %v378_v15  ;;  %385 = vmatprep.subr.bf16.mxu1 %v384_v21  ;;  %v390_v33 = vpack.c.bf16 %v151_v30, %v150_v29  ;;  %v392_v34 = vpack.c.bf16 %v169_v32, %v168_v31  ;;  %v152_v35 = vld [vmem:[#allocation5 + $0x30] sm:$0xff]  ;;  %v153_v36 = vld [vmem:[#allocation5 + $0x38] sm:$0xff]  ;;  %v170_v38 = vld [vmem:[#allocation5 + $0xc0] sm:$0xff]  ;;  %v65_v30 = vsub.s32 1, %v60_v10  ;;  %p487_p5 = por %p486_p4, %p485_p3 }
  0x30   :  { %v394_v37 = vpack.c.bf16 %v153_v36, %v152_v35  ;;  %v171_v39 = vld [vmem:[#allocation5 + $0xc8] sm:$0xff]  ;;  %v154_v41 = vld [vmem:[#allocation5 + $0x40] sm:$0xff]  ;;  %v172_v44 = vld [vmem:[#allocation5 + $0xd0] sm:$0xff] }
  0x31   :  { %v396_v40 = vpack.c.bf16 %v171_v39, %v170_v38  ;;  %v155_v42 = vld [vmem:[#allocation5 + $0x48] sm:$0xff]  ;;  %v173_v45 = vld [vmem:[#allocation5 + $0xd8] sm:$0xff]  ;;  %v156_v47 = vld [vmem:[#allocation5 + $0x50] sm:$0xff]  ;;  %p488_p6 = pnand %p487_p5, %p481_p2 }
  0x32   :  { %334 = vmatmul.mubr.msk.f32.vlgmr.msra.gmra.mrb[0].mxu0 %vm69_vm0, %v46_v27  ;;  %387 = vmatpush3.bf16.msra.mxu1 %v386_v26  ;;  %v398_v43 = vpack.c.bf16 %v155_v42, %v154_v41  ;;  %v400_v46 = vpack.c.bf16 %v173_v45, %v172_v44  ;;  %v157_v48 = vld [vmem:[#allocation5 + $0x58] sm:$0xff]  ;;  %v174_v50 = vld [vmem:[#allocation5 + $0xe0] sm:$0xff]  ;;  %v175_v51 = vld [vmem:[#allocation5 + $0xe8] sm:$0xff] }
  0x33   :  { %389 = vmatprep.subr.bf16.mxu1 %v388_v28  ;;  %v402_v49 = vpack.c.bf16 %v157_v48, %v156_v47  ;;  %v158_v52 = vld [vmem:[#allocation5 + $0x60] sm:$0xff]  ;;  %v404_v53 = vpack.c.bf16 %v175_v51, %v174_v50  ;;  %v159_v54 = vld [vmem:[#allocation5 + $0x68] sm:$0xff]  ;;  %v176_v55 = vld [vmem:[#allocation5 + $0xf0] sm:$0xff] }
  0x34   :  { %v177_v56 = vld [vmem:[#allocation5 + $0xf8] sm:$0xff]  ;;  %v406_v57 = vpack.c.bf16 %v159_v54, %v158_v52  ;;  %v160_v59 = vld [vmem:[#allocation5 + $0x70] sm:$0xff]  ;;  %v254_v62 = vld [vmem:[#allocation5 + $0x101] sm:$0x1] }
  0x35   :  { %v408_v58 = vpack.c.bf16 %v177_v56, %v176_v55  ;;  %v161_v60 = vld [vmem:[#allocation5 + $0x78] sm:$0xff]  ;;  %v256_v63 = vand.u32 2147483647, %v254_v62  ;;  %v255_v11 = vmax.f32 %v254_v62, 0.0  ;;  %v47_v17 = vld [vmem:[%s588_s1] sm:$0xff]  ;;  %s515_s1 = smov 4  }
  0x36   :  { %391 = vmatpush3.bf16.msra.mxu1 %v390_v33  ;;  %v410_v61 = vpack.c.bf16 %v161_v60, %v160_v59  ;;  %v279_v19 = vmul.f32 %v47_v17, %v47_v17  ;;  %v57_v29 = vld [vmem:[#allocation2 + $0x40] ss:$8 sm:$0x3] }
  0x37   :  { %393 = vmatprep.subr.bf16.mxu1 %v392_v34  ;;  %v257_v0 = vsub.f32 0.0, %v256_v63  ;;  %v62_v31 = vrot.slane %v57_v29, %v61_v14  ;;  %v66_v32 = vrot.slane %v57_v29, %v65_v30 }
  0x38   :  { %v280_v22 = vmul.f32 -0.5, %v279_v19 }
  0x39   :  { %v258_v1 = vmul.f32 1.442695, %v257_v0 }
  0x3a   :  { %395 = vmatpush3.bf16.msra.mxu1 %v394_v37 }
  0x3b   :  { %397 = vmatprep.subr.bf16.mxu1 %v396_v40  ;;  %422 = vpow2.f32 %v258_v1  ;;  %v335_v40 = vld [vmem:[#allocation5 + $0x100] ss:$0 sm:$0xff] }
  0x3e   :  { %399 = vmatpush3.bf16.msra.mxu1 %v398_v43 }
  0x3f   :  { %401 = vmatprep.subr.bf16.mxu1 %v400_v46 }
  0x42   :  { %403 = vmatpush3.bf16.msra.mxu1 %v402_v49 }
  0x43   :  { %405 = vmatprep.subr.bf16.mxu1 %v404_v53 }
  0x45   :  { %v423_v2 = vpop.eup %422 }
  0x46   :  { %407 = vmatpush3.bf16.msra.mxu1 %v406_v57  ;;  %v260_v3 = vadd.f32 1.0, %v423_v2  ;;  %v263_v4 = vmul.f32 -0.5, %v423_v2  ;;  %v266_v7 = vand.u32 2147483647, %v423_v2 }
  0x47   :  { %409 = vmatprep.subr.bf16.mxu1 %v408_v58 }
  0x48   :  { %424 = vlog2.f32 %v260_v3  ;;  %v264_v5 = vadd.f32 1.0, %v263_v4  ;;  %vm267_vm1 = vcmp.lt.f32.partialorder %v266_v7, 0.0004427343 }
  0x4a   :  { %411 = vmatpush3.bf16.msra.mxu1 %v410_v61  ;;  %v265_v8 = vmul.f32 %v423_v2, %v264_v5 }
  0x52   :  { %v425_v9 = vpop.eup %424 }
  0x53   :  { %v262_v12 = vmul.f32 0.6931472, %v425_v9 }
  0x55   :  { %v268_v13 = vsel %vm267_vm1, %v265_v8, %v262_v12 }
  0x56   :  { %v269_v15 = vadd.f32 %v268_v13, %v255_v11 }
  0x58   :  { %426 = vlog2.f32 %v269_v15  ;;  %v275_v16 = vrot.slane %v269_v15, %v61_v14 }
  0x5a   :  { %v276_v18 = vmul.f32 %v275_v16, %v47_v17 }
  0x62   :  { %v427_v20 = vpop.eup %426 }
  0x63   :  { %v271_v21 = vmul.f32 0.6931472, %v427_v20 }
  0x65   :  { %v291_v23 = vadd.f32 1.4189385, %v271_v21  ;;  %v284_v24 = vrot.slane %v271_v21, %v61_v14 }
  0x67   :  { %v293_v25 = vsel %vm292_vm2, %v291_v23, 0.0  ;;  %v285_v26 = vsub.f32 %v280_v22, %v284_v24 }
  0x68   :  { %294 = vadd.xlane.f32.xlu0 %v293_v25 }
  0x69   :  { %v336_v27 = vadd.f32 -0.9189385, %v285_v26 }
  0x6b   :  { %v288_v28 = vsel %vm287_vm3, %v336_v27, 0.0 }
  0x6c   :  { %289 = vadd.xlane.f32.xlu0 %v288_v28 }
  0xf5   :  { %v295_v47 = vpop.xlane.xlu0 %294 }
  0xf6   :  { %v299_v50 = vrot.slane %v295_v47, %v61_v14 }
  0xf9   :  { %v290_v48 = vpop.xlane.xlu0 %289 }
 0x105   :  { %v139_v33 = vpop.f32.mrb[0].mxu0 }
 0x106   :  { %v140_v34 = vadd.f32 %v139_v33, %v62_v31  ;;  %v141_v35 = vpop.f32.mrb[1].mxu0 }
 0x107   :  { %v142_v36 = vadd.f32 %v141_v35, %v66_v32 }
 0x109   :  { %428 = vtanh.f32 %v142_v36 }
 0x10a   :  { %430 = vtanh.f32 %v140_v34 }
 0x113   :  { %v429_v37 = vpop.eup %428 }
 0x114   :  { %v431_v38 = vpop.eup %430  ;;  %247 = vmatprep.mubr.f32.mxu1 %v429_v37 }
 0x115   :  { %248 = vmatmul.mubr.f32.vlgmr.msra.gmra.mrb[0].mxu1 %v431_v38 }
 0x1e8   :  { %v369_v39 = vpop.f32.mrb[0].mxu1 }
 0x1e9   :  { %v370_v41 = vpop.f32.mrb[1].mxu1 }
 0x1ea   :  { %v371_v42 = vadd.f32 %v370_v41, %v369_v39 }
 0x1ec   :  { %v250_v43 = vadd.f32 %v371_v42, %v335_v40 }
 0x1ee   :  { %432 = vtanh.f32 %v250_v43 }
 0x1f8   :  { %v433_v44 = vpop.eup %432 }
 0x1f9   :  { %v277_v45 = vadd.f32 %v433_v44, %v276_v18  ;;  %303 = vrot.lane.b32.xlu1 %v433_v44, %s515_s1 }
 0x1fb   :  { %434 = vtanh.f32 %v277_v45 }
 0x1fd   :  { %313 = vrot.lane.b32.xlu1 %v250_v43, %s516_s18 }
 0x205   :  { %v435_v46 = vpop.eup %434 }
 0x206   :  { %301 = vst.msk [vmem:[#allocation7] sm:$0xff] %vm287_vm3, %v435_v46 }
 0x26b   :  { %v304_v49 = vpop.permute.xlu1 %303 }
 0x26c   :  { %307 = vst.msk [vmem:[#allocation7] sm:$0xff] %vm306_vm4, %v304_v49 }
 0x26d   :  { %309 = vst.msk [vmem:[#allocation7] sm:$0xff] %vm308_vm5, %v290_v48 }
 0x26e   :  { %311 = vst.msk [vmem:[#allocation7] sm:$0xff] %vm310_vm6, %v299_v50 }
 0x26f   :  { %v314_v51 = vpop.permute.xlu1 %313 }
 0x270   :  { %317 = vst.msk [vmem:[#allocation7] sm:$0xff] %vm316_vm7, %v314_v51 }
 0x271   :  { %491 = shalt.err (!%p488_p6)
}
 0x272   :  { %s492_s24 = scalar_lea.hbm %s591_s4, 128 }
 0x273   :  { %p493_p7 = scmp.ne.s32.totalorder %s591_s4, %s492_s24  ;;  %p496_p8 = scmp.lt.u32.totalorder %s492_s24, %s591_s4 }
 0x275   :  { %p498_p9 = pnand %p496_p8, %p493_p7 }
 0x277   :  { %501 = shalt.err (!%p498_p9)
}
 0x278   :  { %327 = dma.vmem_to_hbm [thread:$0]  %s325_s20, 128, %s591_s4, [#allocation4]  }
 0x279   :  { %506 = dma.done.wait [#allocation4], 128  }
 0x27a   :  { %507 = vsyncadd [#allocation4], 4294967168 }
 0x27b   :  { %331 = vsyncpa [#allocation3], 1 }
 0x27c   :  { %332 = vsyncpa [#allocation6], 1 }
 0x27d   :  { %333 = vsyncpa [#allocation4], 1 }

</bundles_post_ra>
